<compile_context>
chip_gen: v7x
topology: tpu7x:2x2x1
jax: 0.10.0
libtpu: 0.0.40
codegen_flags: <defaults>
</compile_context>

<pallas_src>
import functools

import jax
import jax.numpy as jnp
from jax.experimental import pallas as pl
from jax.experimental.pallas import tpu as pltpu


def autopad(k, p=None):
    if p is None:
        p = k // 2 if isinstance(k, int) else [x // 2 for x in k]
    return p


def _round_up(x, m):
    return ((x + m - 1) // m) * m


def _cdiv(a, b):
    return (a + b - 1) // b


def _vmem_capacity_bytes():
    try:
        return int(pltpu.get_tpu_info().vmem_capacity_bytes)
    except Exception:
        return 64 * 1024 * 1024  # conservative fallback (v7x per-core VMEM)


def _conv_bn_act_kernel(x_ref, w_ref, shift_ref, o_ref, *, act, cdtype):
    # x_ref:     (C1,  TP)  channels x pixel tile (lane-dense on pixels)
    # w_ref:     (TC2, C1)  1x1 conv weight with BN scale folded in
    # shift_ref: (TC2, 1)   folded BN shift (f32)
    # o_ref:     (TC2, TP)  lane-dense output tile
    x = x_ref[...]
    if x.dtype != cdtype:
        x = x.astype(cdtype)  # in-kernel cast: no extra HBM pre-pass
    y = jnp.dot(w_ref[...], x, preferred_element_type=jnp.float32)
    y = y + shift_ref[...]
    if act:
        # Hardswish: y * relu6(y + 3) / 6, in f32.
        y = y * jnp.clip(y + 3.0, 0.0, 6.0) * (1.0 / 6.0)
    o_ref[...] = y.astype(o_ref.dtype)


def _choose_tiles(C1, C2, P, in_bytes, w_bytes, out_bytes, budget):
    """Pick (TC2, TP) so the full double-buffered working set fits `budget`."""
    tp_cap = min(4096, _round_up(max(P, 1), 128))

    def working_set(tc2, tp):
        return (2 * C1 * tp * in_bytes          # x stream (double buffered)
                + 2 * tc2 * tp * out_bytes      # out stream (double buffered)
                + 2 * tc2 * C1 * w_bytes        # folded weight (double buffered)
                + 2 * tc2 * 4                   # shift
                + tc2 * tp * 4)                 # f32 matmul/epilogue intermediate

    def best_tp(tc2):
        tp = tp_cap
        while tp > 128 and working_set(tc2, tp) > budget:
            tp -= 128
        return tp

    tc2 = C2
    tp = best_tp(tc2)
    # Only if the *budget* (not P itself) pushed the pixel tile below the ~512
    # roofline knee, block output channels instead (the weight is cheap to re-stream).
    while tp < min(512, tp_cap) and tc2 > 8 and tc2 % 2 == 0 and (tc2 // 2) % 8 == 0:
        tc2 //= 2
        tp = best_tp(tc2)
    return tc2, tp, working_set(tc2, tp)


# TODO(synk): k>1 spatial convolution and grouped conv (g>1) are not implemented;
# this kernel covers the module's default k=1, s>=1, g=1 path.
@functools.partial(jax.jit,
                   static_argnames=("stride", "eps", "act", "compute_dtype", "out_dtype"))
def conv_forward(x, w, gamma, beta, running_mean, running_var, *,
                 stride=1, eps=1e-5, act=True, compute_dtype=None, out_dtype=None):
    """Conv.forward: Hardswish(BN(Conv2d(c1, c2, k=1, s, bias=False)(x))).

    x: (N, C1, H, W) NCHW (matching PyTorch), w: (C2, C1, 1, 1).
    """
    N, C1, H, W = x.shape
    C2, C1w, kh, kw = w.shape
    assert (kh, kw) == (1, 1) and C1w == C1, "only the k=1, g=1 Conv path is supported"

    if stride > 1:
        # k=1 => autopad gives p=0; striding is plain spatial subsampling.
        # TODO(synk): subsample inside the kernel (strided pl.ds / Element-indexed
        # rows) to avoid this extra HBM gather pass for stride>1 layers.
        x = x[..., ::stride, ::stride]
        H, W = x.shape[2], x.shape[3]

    P = H * W
    cdtype = jnp.dtype(compute_dtype) if compute_dtype is not None else x.dtype
    odtype = jnp.dtype(out_dtype) if out_dtype is not None else x.dtype

    in_bytes = x.dtype.itemsize                 # x streamed in its own dtype (no pre-cast)
    w_bytes = jnp.dtype(cdtype).itemsize
    out_bytes = jnp.dtype(odtype).itemsize

    # Fold eval-mode BatchNorm into the conv weight + an additive f32 shift.
    scale = gamma / jnp.sqrt(running_var + eps)                      # (C2,)
    w_folded = (w.reshape(C2, C1) * scale[:, None]).astype(cdtype)   # (C2, C1)
    shift = (beta - running_mean * scale).reshape(C2, 1).astype(jnp.float32)

    # Channels x pixels layout: NCHW -> (N, C1, P) is a free reshape.
    xm = x.reshape(N, C1, P)

    # Per-generation tiling from the chip's actual VMEM capacity.
    phys_vmem = _vmem_capacity_bytes()
    budget = min(32 << 20, phys_vmem // 4)      # v5e/v6e: 32 MiB, v7x: 16 MiB
    TC2, TP, ws = _choose_tiles(C1, C2, P, in_bytes, w_bytes, out_bytes, budget)

    # v7x megacore: ensure >=2 parallel programs so both TensorCores get work.
    def n_programs(tp):
        return N * _cdiv(P, tp) * (C2 // TC2)
    while n_programs(TP) < 2 and TP > 128:
        TP = max(128, (TP // 2 // 128) * 128)

    grid = (N, _cdiv(P, TP), C2 // TC2)         # partial last pixel block handled by Pallas

    vmem_limit = int(min(phys_vmem // 2, max(2 * ws, 16 << 20)))

    cost = pl.CostEstimate(
        flops=2 * N * C2 * C1 * P,
        transcendentals=0,
        bytes_accessed=(N * C1 * P * in_bytes + C2 * C1 * w_bytes
                        + C2 * 4 + N * C2 * P * out_bytes))

    out = pl.pallas_call(
        functools.partial(_conv_bn_act_kernel, act=act, cdtype=cdtype),
        out_shape=jax.ShapeDtypeStruct((N, C2, P), odtype),
        grid_spec=pltpu.PrefetchScalarGridSpec(
            num_scalar_prefetch=0,
            grid=grid,
            in_specs=[
                # x tile is independent of the innermost C2-block index, so it
                # stays resident in VMEM while output-channel blocks iterate.
                pl.BlockSpec((None, C1, TP), lambda n, p, c: (n, 0, p)),
                pl.BlockSpec((TC2, C1), lambda n, p, c: (c, 0)),
                pl.BlockSpec((TC2, 1), lambda n, p, c: (c, 0)),
            ],
            out_specs=pl.BlockSpec((None, TC2, TP), lambda n, p, c: (n, c, p)),
        ),
        compiler_params=pltpu.CompilerParams(
            dimension_semantics=("parallel", "parallel", "parallel"),
            vmem_limit_bytes=vmem_limit),
        cost_estimate=cost,
    )(xm, w_folded, shift)

    # (N, C2, P) -> NCHW is a free reshape (no pad to strip).
    return out.reshape(N, C2, H, W)


def _reference(x, w, gamma, beta, running_mean, running_var, eps=1e-5):
    C2, C1 = w.shape[0], w.shape[1]
    y = jnp.einsum('nchw,oc->nohw', x, w.reshape(C2, C1))
    scale = gamma / jnp.sqrt(running_var + eps)
    shift = beta - running_mean * scale
    y = y * scale[None, :, None, None] + shift[None, :, None, None]
    return y * jnp.clip(y + 3.0, 0.0, 6.0) / 6.0


if __name__ == "__main__":
    key = jax.random.PRNGKey(0)
    kx, kw, kg, kb, km, kv = jax.random.split(key, 6)

    # Small shapes consistent with Conv(c1=4, c2=32, k=1): batch=2, spatial=16.
    N, C1, H, W = 2, 4, 16, 16
    C2 = 32

    x = jax.random.normal(kx, (N, C1, H, W), dtype=jnp.float32)
    w = jax.random.normal(kw, (C2, C1, 1, 1), dtype=jnp.float32) * 0.1
    gamma = 1.0 + 0.1 * jax.random.normal(kg, (C2,), dtype=jnp.float32)
    beta = 0.1 * jax.random.normal(kb, (C2,), dtype=jnp.float32)
    running_mean = 0.05 * jax.random.normal(km, (C2,), dtype=jnp.float32)
    running_var = 1.0 + jax.nn.softplus(jax.random.normal(kv, (C2,), dtype=jnp.float32))

    ref = _reference(x, w, gamma, beta, running_mean, running_var)

    # 1) Default f32 path.
    out = conv_forward(x, w, gamma, beta, running_mean, running_var)
    jax.block_until_ready(out)
    assert out.shape == (N, C2, H, W), out.shape
    assert jnp.allclose(out, ref, atol=1e-5, rtol=1e-5)

    # 2) bf16 compute path (in-kernel cast; f32 accumulation on MXU).
    out_bf16c = conv_forward(x, w, gamma, beta, running_mean, running_var,
                             compute_dtype=jnp.bfloat16)
    jax.block_until_ready(out_bf16c)
    assert jnp.allclose(out_bf16c, ref, atol=5e-2, rtol=5e-2)

    # 3) bf16 output path (halves output writeback).
    out_bf16o = conv_forward(x, w, gamma, beta, running_mean, running_var,
                             out_dtype=jnp.bfloat16)
    jax.block_until_ready(out_bf16o)
    assert out_bf16o.dtype == jnp.bfloat16
    assert jnp.allclose(out_bf16o.astype(jnp.float32), ref, atol=5e-2, rtol=5e-2)

    # 4) stride=2 path (k=1 => pure spatial subsampling).
    out_s2 = conv_forward(x, w, gamma, beta, running_mean, running_var, stride=2)
    jax.block_until_ready(out_s2)
    ref_s2 = _reference(x[..., ::2, ::2], w, gamma, beta, running_mean, running_var)
    assert out_s2.shape == (N, C2, H // 2, W // 2), out_s2.shape
    assert jnp.allclose(out_s2, ref_s2, atol=1e-5, rtol=1e-5)

    print("KERNEL_OK")
</pallas_src>

<mosaic_0001>
module attributes {stable_mosaic.version = 11 : i64} {
  func.func @_conv_bn_act_kernel(%arg0: i32, %arg1: i32, %arg2: i32, %arg3: memref<1x4x256xf32, #tpu.memory_space<vmem>>, %arg4: memref<32x4xf32, #tpu.memory_space<vmem>>, %arg5: memref<32x1xf32, #tpu.memory_space<vmem>>, %arg6: memref<1x32x256xf32, #tpu.memory_space<vmem>>) attributes {dimension_semantics = [#tpu.dimension_semantics<parallel>, #tpu.dimension_semantics<parallel>, #tpu.dimension_semantics<parallel>], iteration_bounds = array<i64: 2, 1, 1>, scalar_prefetch = 0 : i64, scratch_operands = 0 : i64, tpu.core_type = #tpu.core_type<tc>, window_params = [{transform_indices = @transform_0, window_bounds = array<i64: 1, 4, 256>}, {transform_indices = @transform_1, window_bounds = array<i64: 32, 4>}, {transform_indices = @transform_2, window_bounds = array<i64: 32, 1>}, {transform_indices = @transform_3, window_bounds = array<i64: 1, 32, 256>}]} {
    %c0 = arith.constant 0 : index
    %c0_0 = arith.constant 0 : index
    %c0_1 = arith.constant 0 : index
    %0 = vector.load %arg3[%c0, %c0_0, %c0_1] : memref<1x4x256xf32, #tpu.memory_space<vmem>>, vector<1x4x256xf32>
    %1 = vector.shape_cast %0 : vector<1x4x256xf32> to vector<4x256xf32>
    %c0_2 = arith.constant 0 : index
    %c0_3 = arith.constant 0 : index
    %2 = vector.load %arg4[%c0_2, %c0_3] : memref<32x4xf32, #tpu.memory_space<vmem>>, vector<32x4xf32>
    %cst = arith.constant dense<0.000000e+00> : vector<32x256xf32>
    %3 = tpu.matmul %2, %1, %cst {dimension_numbers = #tpu.dot_dimension_numbers<[1], [0], [0], [1], [0, 0, 1, 1], [], []>} : vector<32x4xf32>, vector<4x256xf32>, vector<32x256xf32> -> vector<32x256xf32>
    %c0_4 = arith.constant 0 : index
    %c0_5 = arith.constant 0 : index
    %4 = vector.load %arg5[%c0_4, %c0_5] : memref<32x1xf32, #tpu.memory_space<vmem>>, vector<32x1xf32>
    %5 = vector.broadcast %4 : vector<32x1xf32> to vector<32x256xf32>
    %6 = arith.addf %3, %5 : vector<32x256xf32>
    %cst_6 = arith.constant 3.000000e+00 : f32
    %7 = vector.broadcast %cst_6 : f32 to vector<32x256xf32>
    %8 = arith.addf %6, %7 : vector<32x256xf32>
    %cst_7 = arith.constant 0.000000e+00 : f32
    %cst_8 = arith.constant 6.000000e+00 : f32
    %9 = vector.broadcast %cst_7 : f32 to vector<32x256xf32>
    %10 = arith.maximumf %9, %8 : vector<32x256xf32>
    %11 = vector.broadcast %cst_8 : f32 to vector<32x256xf32>
    %12 = arith.minimumf %11, %10 : vector<32x256xf32>
    %13 = arith.mulf %6, %12 : vector<32x256xf32>
    %cst_9 = arith.constant 0.166666672 : f32
    %14 = vector.broadcast %cst_9 : f32 to vector<32x256xf32>
    %15 = arith.mulf %13, %14 : vector<32x256xf32>
    %c0_10 = arith.constant 0 : index
    %c0_11 = arith.constant 0 : index
    %c0_12 = arith.constant 0 : index
    %16 = vector.load %arg6[%c0_10, %c0_11, %c0_12] : memref<1x32x256xf32, #tpu.memory_space<vmem>>, vector<1x32x256xf32>
    %17 = vector.shape_cast %16 : vector<1x32x256xf32> to vector<32x256xf32>
    %18 = vector.shape_cast %15 : vector<32x256xf32> to vector<1x32x256xf32>
    tpu.vector_store %arg6[%c0_10, %c0_11, %c0_12], %18 {strides = array<i32>} : memref<1x32x256xf32, #tpu.memory_space<vmem>>, vector<1x32x256xf32>,
    return
  }
  func.func @transform_0(%arg0: i32, %arg1: i32, %arg2: i32) -> (i32, i32, i32) {
    %c0_i32 = arith.constant 0 : i32
    %c0_i32_0 = arith.constant 0 : i32
    return %arg0, %c0_i32, %arg1 : i32, i32, i32
  }
  func.func @transform_1(%arg0: i32, %arg1: i32, %arg2: i32) -> (i32, i32) {
    %c0_i32 = arith.constant 0 : i32
    %c0_i32_0 = arith.constant 0 : i32
    return %arg2, %c0_i32 : i32, i32
  }
  func.func @transform_2(%arg0: i32, %arg1: i32, %arg2: i32) -> (i32, i32) {
    %c0_i32 = arith.constant 0 : i32
    %c0_i32_0 = arith.constant 0 : i32
    return %arg2, %c0_i32 : i32, i32
  }
  func.func @transform_3(%arg0: i32, %arg1: i32, %arg2: i32) -> (i32, i32, i32) {
    %c0_i32 = arith.constant 0 : i32
    return %arg0, %arg2, %arg1 : i32, i32, i32
  }
}

</mosaic_0001>

<bundles_post_ra>
// kernel: conv_forward.1
= control target key start
LH: loop header
LB: loop body
LE: loop exit
PB: predicated region body
PF: predicated region fallthrough
CT: control target
= control target key end

     0   :  { %s697_s12 = smov 0   ;;  %s699_s13 = smov 0   ;;  %s758_s0 = inlined_call_operand.vmem [shape: f32[2,4,256], index: 0, kind: input, shape index: {}]   ;;  %s759_s1 = inlined_call_operand.vmem [shape: f32[32,4], index: 1, kind: input, shape index: {}]   ;;  %s760_s2 = inlined_call_operand.vmem [shape: f32[32,1], index: 2, kind: input, shape index: {}]   ;;  %s761_s3 = inlined_call_operand.vmem [shape: f32[2,32,256], index: 3, kind: output, shape index: {}]  }
   0x1   :  { %s701_s14 = smov 0  }
   0x2 LB: > { %s32_s15 = sadd.s32 1, %s669_s13  ;;  %p605_p0 = scmp.ge.s32.totalorder %s673_s14, 1  ;;  %s673_s14 = sphi %s701_s14, %s13_s14   ;;  %s669_s13 = sphi %s699_s13, %s763_s13   ;;  %s665_s12 = sphi %s697_s12, %s762_s12  }
   0x3   : > { %p34_p1 = scmp.ge.s32.totalorder %s32_s15, 2  ;;  %p189_p2 = scmp.lt.s32.totalorder %s673_s14, 3 }
   0x5   : > { %s765_s15 = smov (%p34_p1, %s32_s15), 0  ;;  %p190_p3 = pnand %p605_p0, %p189_p2 }
   0x6   : > { %p237_p4 = scmp.lt.s32.totalorder (!%p190_p3), %s665_s12, 1  ;;  %v675_v0 = vmov (!%p190_p3), 0.0   ;;  %v281_v1 = vld [vmem:[%s760_s2 + $0x10] sm:$0xff] (!%p190_p3)  ;;  %v676_v2 = vmov (!%p190_p3), 0   ;;  %v279_v3 = vld [vmem:[%s760_s2] sm:$0xff] (!%p190_p3)  ;;  %v282_v4 = vld [vmem:[%s760_s2 + $0x18] sm:$0xff] (!%p190_p3) }
   0x7   : > { %193 = sbr.rel (%p190_p3) target bundleno = 252 (0xfc), region = 32  ;;  %387 = vmatprep.mubr.f32.mxu0 (!%p190_p3), %v675_v0  ;;  %399 = vmatprep.mubr.f32.mxu1 (!%p190_p3), %v675_v0  ;;  %v280_v5 = vld [vmem:[%s760_s2 + $0x8] sm:$0xff] (!%p190_p3)  ;;  %vm318_vm0 = vcmask (!%p190_p3), 1043456   ;;  %v275_v8 = vld [vmem:[%s759_s1] sm:$0xff] (!%p190_p3)  ;;  %vm305_vm1 = vcmask (!%p190_p3), 31744   ;;  %v277_v9 = vld [vmem:[%s759_s1 + $0x10] sm:$0xff] (!%p190_p3) }
   0x8   : > { %649 = vset.pattern.permute.xlu1 (!%p190_p3), %v676_v2  ;;  %648 = vset.pattern.permute.xlu0 (!%p190_p3), %v676_v2  ;;  %v276_v10 = vld [vmem:[%s759_s1 + $0x8] sm:$0xff] (!%p190_p3)  ;;  %v278_v11 = vld [vmem:[%s759_s1 + $0x18] sm:$0xff] (!%p190_p3) }
   0x9   : > { %295 = vperm.xlu1 (!%p190_p3), %649, %v281_v1   ;;  %285 = vperm.xlu0 (!%p190_p3), %648, %v279_v3  }
   0xd   : > { %300 = vperm.xlu1 (!%p190_p3), %649, %v282_v4   ;;  %290 = vperm.xlu0 (!%p190_p3), %648, %v280_v5  }
   0xe   : > { %s767_s12 = smov (!%p237_p4, %s665_s12), 1 }
   0xf   : > { %s618_s20 = sshll.u32 %s767_s12, 3  ;;  %s619_s9 = sshll.u32 %s767_s12, 6 }
  0x10   : > { %s244_s27 = scalar_lea.vmem %s758_s0, %s618_s20  ;;  %s271_s16 = scalar_lea.vmem %s761_s3, %s619_s9 }
  0x11   : > { %v274_v6 = vld [vmem:[%s244_s27] sm:$0xff] }
  0x12   : > { %v304_v7 = vcombine.high %v274_v6, %v274_v6 }
  0x14   : > { %610 = vmatprep.subr.msk.mxu0 %vm318_vm0, %v304_v7  ;;  %620 = vmatprep.subr.msk.mxu1 %vm318_vm0, %v304_v7 }
  0x15   : > { %611 = vmatpush1.msk.msra.mxu0 %vm318_vm0, %v274_v6  ;;  %621 = vmatpush1.msk.msra.mxu1 %vm318_vm0, %v274_v6 }
  0x16   : > { %612 = vmatmul.mubr.msk.f32.vlgmr.msra.gmra.mrb[0].mxu0 %vm305_vm1, %v275_v8  ;;  %614 = vmatmul.mubr.msk.f32.vlgmr.msra.gmra.mrb[0].mxu1 %vm305_vm1, %v277_v9 }
  0x17   : > { %393 = vmatprep.mubr.f32.mxu0 %v675_v0  ;;  %405 = vmatprep.mubr.f32.mxu1 %v675_v0 }
  0x1a   : > { %613 = vmatmul.mubr.msk.f32.gmra.mrb[2].mxu0 %vm305_vm1, %v276_v10  ;;  %615 = vmatmul.mubr.msk.f32.gmra.mrb[2].mxu1 %vm305_vm1, %v278_v11 }
  0x88   : > { %v296_v12 = vpop.permute.xlu1 %295  ;;  %v286_v13 = vpop.permute.xlu0 %285 }
  0x8c   : > { %v301_v24 = vpop.permute.xlu1 %300  ;;  %v291_v25 = vpop.permute.xlu0 %290 }
  0xe9   : > { %v389_v14 = vpop.f32.mrb[0].mxu0  ;;  %v401_v15 = vpop.f32.mrb[0].mxu1 }
  0xea   : > { %v390_v16 = vadd.f32 %v389_v14, %v286_v13  ;;  %v402_v17 = vadd.f32 %v401_v15, %v296_v12  ;;  %v391_v18 = vpop.f32.mrb[1].mxu0  ;;  %v403_v19 = vpop.f32.mrb[1].mxu1 }
  0xeb   : > { %v392_v20 = vadd.f32 %v391_v18, %v286_v13  ;;  %v404_v21 = vadd.f32 %v403_v19, %v296_v12 }
  0xec   : > { %v412_v22 = vadd.f32 3.0, %v390_v16  ;;  %v416_v23 = vadd.f32 3.0, %v402_v17 }
  0xed   : > { %v413_v26 = vadd.f32 3.0, %v392_v20  ;;  %v417_v27 = vadd.f32 3.0, %v404_v21  ;;  %v395_v28 = vpop.f32.mrb[2].mxu0  ;;  %v407_v29 = vpop.f32.mrb[2].mxu1 }
  0xee   : > { %v420_v30 = vmax.f32 %v412_v22, 0.0  ;;  %v424_v31 = vmax.f32 %v416_v23, 0.0  ;;  %v396_v32 = vadd.f32 %v395_v28, %v291_v25  ;;  %v408_v33 = vadd.f32 %v407_v29, %v301_v24  ;;  %v397_v34 = vpop.f32.mrb[3].mxu0  ;;  %v409_v35 = vpop.f32.mrb[3].mxu1 }
  0xef   : > { %v421_v36 = vmax.f32 %v413_v26, 0.0  ;;  %v425_v37 = vmax.f32 %v417_v27, 0.0  ;;  %v398_v38 = vadd.f32 %v397_v34, %v291_v25  ;;  %v410_v39 = vadd.f32 %v409_v35, %v301_v24 }
  0xf0   : > { %v428_v40 = vmin.f32 %v420_v30, 6.0  ;;  %v432_v41 = vmin.f32 %v424_v31, 6.0  ;;  %v414_v42 = vadd.f32 3.0, %v396_v32  ;;  %v418_v43 = vadd.f32 3.0, %v408_v33 }
  0xf1   : > { %v429_v44 = vmin.f32 %v421_v36, 6.0  ;;  %v433_v45 = vmin.f32 %v425_v37, 6.0  ;;  %v415_v46 = vadd.f32 3.0, %v398_v38  ;;  %v419_v47 = vadd.f32 3.0, %v410_v39 }
  0xf2   : > { %v436_v48 = vmul.f32 %v428_v40, %v390_v16  ;;  %v440_v49 = vmul.f32 %v432_v41, %v402_v17  ;;  %v422_v50 = vmax.f32 %v414_v42, 0.0  ;;  %v426_v51 = vmax.f32 %v418_v43, 0.0 }
  0xf3   : > { %v437_v52 = vmul.f32 %v429_v44, %v392_v20  ;;  %v441_v53 = vmul.f32 %v433_v45, %v404_v21  ;;  %v423_v54 = vmax.f32 %v415_v46, 0.0  ;;  %v427_v55 = vmax.f32 %v419_v47, 0.0 }
  0xf4   : > { %v444_v56 = vmul.f32 0.16666667, %v436_v48  ;;  %v448_v57 = vmul.f32 0.16666667, %v440_v49  ;;  %v430_v58 = vmin.f32 %v422_v50, 6.0  ;;  %v434_v59 = vmin.f32 %v426_v51, 6.0 }
  0xf5   : > { %v445_v60 = vmul.f32 0.16666667, %v437_v52  ;;  %v449_v61 = vmul.f32 0.16666667, %v441_v53  ;;  %v431_v62 = vmin.f32 %v423_v54, 6.0  ;;  %v435_v63 = vmin.f32 %v427_v55, 6.0 }
  0xf6   : > { %452 = vst [vmem:[%s271_s16] sm:$0xff] %v444_v56  ;;  %456 = vst [vmem:[%s271_s16 + $0x20] sm:$0xff] %v448_v57  ;;  %v438_v0 = vmul.f32 %v430_v58, %v396_v32  ;;  %v442_v1 = vmul.f32 %v434_v59, %v408_v33 }
  0xf7   : > { %453 = vst [vmem:[%s271_s16 + $0x8] sm:$0xff] %v445_v60  ;;  %457 = vst [vmem:[%s271_s16 + $0x28] sm:$0xff] %v449_v61  ;;  %v439_v2 = vmul.f32 %v431_v62, %v398_v38  ;;  %v443_v3 = vmul.f32 %v435_v63, %v410_v39 }
  0xf8   : > { %v446_v4 = vmul.f32 0.16666667, %v438_v0  ;;  %v450_v5 = vmul.f32 0.16666667, %v442_v1 }
  0xf9   : > { %v447_v6 = vmul.f32 0.16666667, %v439_v2  ;;  %v451_v7 = vmul.f32 0.16666667, %v443_v3 }
  0xfa   : > { %454 = vst [vmem:[%s271_s16 + $0x10] sm:$0xff] %v446_v4  ;;  %458 = vst [vmem:[%s271_s16 + $0x30] sm:$0xff] %v450_v5 }
  0xfb   : > { %455 = vst [vmem:[%s271_s16 + $0x18] sm:$0xff] %v447_v6  ;;  %459 = vst [vmem:[%s271_s16 + $0x38] sm:$0xff] %v451_v7 }
  0xfc PF: > { %s13_s14 = sadd.s32 1, %s673_s14   ;;  %s762_s12 = smov %s669_s13 }
  0xfd   : > { %p10_p5 = scmp.ge.s32.totalorder %s13_s14, 4   ;;  %s763_s13 = smov %s765_s15 }
  0xff   :  { %12 = sbr.rel (!%p10_p5) target bundleno = 2 (0x2), region = 68 }

</bundles_post_ra>
